<compile_context>
chip_gen: v7x
topology: tpu7x:2x2x1
jax: 0.10.0
libtpu: 0.0.40
codegen_flags: <defaults>
</compile_context>

<pallas_src>
import jax
import jax.numpy as jnp
from jax.experimental import pallas as pl
from jax.experimental.pallas import tpu as pltpu


LEAKY_SLOPE = 0.01  # F.leaky_relu default negative_slope
H1, H2 = 256, 128   # hidden widths of dense1 / dense2


def _leaky_relu(x):
    return jnp.where(x > 0, x, LEAKY_SLOPE * x)


def _round_up(x, m):
    return ((x + m - 1) // m) * m


def critic_kernel(s_ref, a_ref,
                  w1_ref, b1_ref,
                  w2h_ref, w2a_ref, b2_ref,
                  w3_ref, b3_ref,
                  out_ref):
    # ---- dense1 + leaky_relu ---------------------------------------------
    # bf16 operands feed the MXU at full rate; accumulate in f32.
    h1 = jnp.dot(s_ref[...].astype(jnp.bfloat16),
                 w1_ref[...].astype(jnp.bfloat16),
                 preferred_element_type=jnp.float32)
    h1 = _leaky_relu(h1 + b1_ref[...])          # f32 elementwise (v5e-safe)

    # ---- dense2 on concat([h1, action]) ------------------------------------
    # concat fused as a split matmul: [h1, a] @ W2 == h1 @ W2_h + a @ W2_a.
    h2 = (jnp.dot(h1.astype(jnp.bfloat16),
                  w2h_ref[...].astype(jnp.bfloat16),
                  preferred_element_type=jnp.float32)
          + jnp.dot(a_ref[...].astype(jnp.bfloat16),
                    w2a_ref[...].astype(jnp.bfloat16),
                    preferred_element_type=jnp.float32)
          + b2_ref[...])
    h2 = _leaky_relu(h2)

    # ---- dense3 (out_features = 1) -----------------------------------------
    # An N=1 MXU matmul uses 1 of 128/256 result columns; do it as a VPU
    # multiply + lane reduction instead (those slots are otherwise idle).
    out = jnp.sum(h2 * w3_ref[...], axis=-1, keepdims=True) + b3_ref[0, 0]
    out_ref[...] = out.astype(out_ref.dtype)


def critic_forward(state, action, params, *, tile_b=1024):
    """state: (B, nS) f32, action: (B, nA) f32 -> (B, 1) f32."""
    B, nS = state.shape
    nA = action.shape[1]
    w1, b1, w2h, w2a, b2, w3, b3 = (
        params["w1"], params["b1"], params["w2h"], params["w2a"],
        params["b2"], params["w3"], params["b3"],
    )

    # Tile the batch; pad B up to a multiple of the tile (zero rows are
    # computed and then sliced away -- harmless for a pure feed-forward net).
    tile_b = _round_up(max(8, min(tile_b, _round_up(B, 8))), 8)
    b_pad = _round_up(B, tile_b)
    if b_pad != B:
        state = jnp.pad(state, ((0, b_pad - B), (0, 0)))
        action = jnp.pad(action, ((0, b_pad - B), (0, 0)))
    grid = (b_pad // tile_b,)

    # Batch-tiled operands.
    s_spec = pl.BlockSpec((tile_b, nS), lambda i: (i, 0))
    a_spec = pl.BlockSpec((tile_b, nA), lambda i: (i, 0))
    o_spec = pl.BlockSpec((tile_b, 1), lambda i: (i, 0))

    # Weights / biases: constant index_map -> fetched once, VMEM-resident.
    def resident(arr):
        return pl.BlockSpec(arr.shape, lambda i: (0,) * arr.ndim)

    # b3 is a single scalar: keep it in SMEM (one scalar load per tile).
    b3_spec = pl.BlockSpec(memory_space=pltpu.MemorySpace.SMEM)

    flops = 2 * b_pad * (nS * H1 + H1 * H2 + nA * H2 + H2)
    bytes_accessed = 4 * (b_pad * (nS + nA + 1)
                          + nS * H1 + H1 + H1 * H2 + nA * H2 + H2 + H2 + 1)

    out = pl.pallas_call(
        critic_kernel,
        out_shape=jax.ShapeDtypeStruct((b_pad, 1), jnp.float32),
        grid=grid,
        in_specs=[s_spec, a_spec,
                  resident(w1), resident(b1),
                  resident(w2h), resident(w2a), resident(b2),
                  resident(w3), b3_spec],
        out_specs=o_spec,
        compiler_params=pltpu.CompilerParams(
            dimension_semantics=("parallel",),
            vmem_limit_bytes=32 * 1024 * 1024,
        ),
        cost_estimate=pl.CostEstimate(
            flops=flops, transcendentals=0, bytes_accessed=bytes_accessed),
    )(state, action, w1, b1, w2h, w2a, b2, w3, b3)
    return out[:B]


def init_params(key, nA, nS):
    """Deterministic parameter init mirroring the module's shapes/ranges."""
    k = jax.random.split(key, 7)
    lim1 = 1.0 / jnp.sqrt(jnp.float32(H1))   # hidden_init uses weight.size()[0]
    lim2 = 1.0 / jnp.sqrt(jnp.float32(H2))
    return {
        # dense1: PyTorch weight (256, nS) -> stored transposed (nS, 256)
        "w1": jax.random.uniform(k[0], (nS, H1), jnp.float32, -lim1, lim1),
        "b1": jax.random.uniform(k[1], (1, H1), jnp.float32, -lim1, lim1),
        # dense2: PyTorch weight (128, nA+256) -> split & transposed
        "w2h": jax.random.uniform(k[2], (H1, H2), jnp.float32, -lim2, lim2),
        "w2a": jax.random.uniform(k[3], (nA, H2), jnp.float32, -lim2, lim2),
        "b2": jax.random.uniform(k[4], (1, H2), jnp.float32, -lim2, lim2),
        # dense3: uniform(-0.004, 0.004); stored as a (1, 128) row for the
        # VPU multiply + lane-reduce epilogue.
        "w3": jax.random.uniform(k[5], (1, H2), jnp.float32, -0.004, 0.004),
        "b3": jax.random.uniform(k[6], (1, 1), jnp.float32, -0.004, 0.004),
    }


def critic_reference(state, action, p):
    """Plain-JAX f32 reference of the original module math."""
    x = jnp.dot(state, p["w1"]) + p["b1"]
    x = _leaky_relu(x)
    x = jnp.dot(x, p["w2h"]) + jnp.dot(action, p["w2a"]) + p["b2"]
    x = _leaky_relu(x)
    return jnp.sum(x * p["w3"], axis=-1, keepdims=True) + p["b3"]


def critic_reference_bf16(state, action, p):
    """Reference using the kernel's exact bf16-operand / f32-accumulate math."""
    bf = lambda t: t.astype(jnp.bfloat16)
    x = jnp.dot(bf(state), bf(p["w1"]), preferred_element_type=jnp.float32) + p["b1"]
    x = _leaky_relu(x)
    x = (jnp.dot(bf(x), bf(p["w2h"]), preferred_element_type=jnp.float32)
         + jnp.dot(bf(action), bf(p["w2a"]), preferred_element_type=jnp.float32)
         + p["b2"])
    x = _leaky_relu(x)
    return jnp.sum(x * p["w3"], axis=-1, keepdims=True) + p["b3"]


if __name__ == "__main__":
    B, nS, nA = 256, 32, 8
    key = jax.random.PRNGKey(0)
    k_s, k_a, k_p = jax.random.split(key, 3)

    state = jax.random.normal(k_s, (B, nS), jnp.float32)
    action = jax.random.normal(k_a, (B, nA), jnp.float32)
    params = init_params(k_p, nA, nS)

    # tile_b=128 -> grid of 2 batch tiles even at this small demo batch
    # (exercises the pipeline and both TensorCores on v7x).
    out = critic_forward(state, action, params, tile_b=128)
    out = jax.block_until_ready(out)
    assert out.shape == (B, 1)

    # Tight check vs a reference using identical bf16-operand math.
    ref_matched = critic_reference_bf16(state, action, params)
    assert jnp.allclose(out, ref_matched, atol=1e-4, rtol=1e-3), \
        "mismatch vs bf16-matched reference"

    # Looser check vs the pure-f32 reference (original module semantics).
    ref_f32 = critic_reference(state, action, params)
    assert jnp.allclose(out, ref_f32, atol=1e-3, rtol=1e-2), \
        "mismatch vs f32 reference"

    print("KERNEL_OK")
</pallas_src>

<mosaic_0001>
module attributes {stable_mosaic.version = 11 : i64} {
  func.func @critic_kernel(%arg0: i32, %arg1: memref<128x32xf32, #tpu.memory_space<vmem>>, %arg2: memref<128x8xf32, #tpu.memory_space<vmem>>, %arg3: memref<32x256xf32, #tpu.memory_space<vmem>>, %arg4: memref<1x256xf32, #tpu.memory_space<vmem>>, %arg5: memref<256x128xf32, #tpu.memory_space<vmem>>, %arg6: memref<8x128xf32, #tpu.memory_space<vmem>>, %arg7: memref<1x128xf32, #tpu.memory_space<vmem>>, %arg8: memref<1x128xf32, #tpu.memory_space<vmem>>, %arg9: memref<1x1xf32, #tpu.memory_space<smem>>, %arg10: memref<128x1xf32, #tpu.memory_space<vmem>>) attributes {dimension_semantics = [#tpu.dimension_semantics<parallel>], iteration_bounds = array<i64: 2>, scalar_prefetch = 0 : i64, scratch_operands = 0 : i64, tpu.core_type = #tpu.core_type<tc>, window_params = [{transform_indices = @transform_0, window_bounds = array<i64: 128, 32>}, {transform_indices = @transform_1, window_bounds = array<i64: 128, 8>}, {pipeline_mode = #tpu.pipeline_mode<synchronous>, transform_indices = @transform_2, window_bounds = array<i64: 32, 256>}, {pipeline_mode = #tpu.pipeline_mode<synchronous>, transform_indices = @transform_3, window_bounds = array<i64: 1, 256>}, {pipeline_mode = #tpu.pipeline_mode<synchronous>, transform_indices = @transform_4, window_bounds = array<i64: 256, 128>}, {pipeline_mode = #tpu.pipeline_mode<synchronous>, transform_indices = @transform_5, window_bounds = array<i64: 8, 128>}, {pipeline_mode = #tpu.pipeline_mode<synchronous>, transform_indices = @transform_6, window_bounds = array<i64: 1, 128>}, {pipeline_mode = #tpu.pipeline_mode<synchronous>, transform_indices = @transform_7, window_bounds = array<i64: 1, 128>}, {transform_indices = @transform_8, window_bounds = array<i64: 1, 1>}, {transform_indices = @transform_9, window_bounds = array<i64: 128, 1>}]} {
    %c0 = arith.constant 0 : index
    %c0_0 = arith.constant 0 : index
    %0 = vector.load %arg1[%c0, %c0_0] : memref<128x32xf32, #tpu.memory_space<vmem>>, vector<128x32xf32>
    %1 = arith.truncf %0 : vector<128x32xf32> to vector<128x32xbf16>
    %c0_1 = arith.constant 0 : index
    %c0_2 = arith.constant 0 : index
    %2 = vector.load %arg3[%c0_1, %c0_2] : memref<32x256xf32, #tpu.memory_space<vmem>>, vector<32x256xf32>
    %3 = arith.truncf %2 : vector<32x256xf32> to vector<32x256xbf16>
    %cst = arith.constant dense<0.000000e+00> : vector<128x256xf32>
    %4 = tpu.matmul %1, %3, %cst {dimension_numbers = #tpu.dot_dimension_numbers<[1], [0], [0], [1], [0, 0, 1, 1], [], []>} : vector<128x32xbf16>, vector<32x256xbf16>, vector<128x256xf32> -> vector<128x256xf32>
    %c0_3 = arith.constant 0 : index
    %c0_4 = arith.constant 0 : index
    %5 = vector.load %arg4[%c0_3, %c0_4] : memref<1x256xf32, #tpu.memory_space<vmem>>, vector<1x256xf32>
    %6 = vector.broadcast %5 : vector<1x256xf32> to vector<128x256xf32>
    %7 = arith.addf %4, %6 : vector<128x256xf32>
    %cst_5 = arith.constant 0.000000e+00 : f32
    %8 = vector.broadcast %cst_5 : f32 to vector<128x256xf32>
    %9 = arith.cmpf ogt, %7, %8 : vector<128x256xf32>
    %cst_6 = arith.constant 0.00999999977 : f32
    %10 = vector.broadcast %cst_6 : f32 to vector<128x256xf32>
    %11 = arith.mulf %10, %7 : vector<128x256xf32>
    %12 = arith.select %9, %7, %11 : vector<128x256xi1>, vector<128x256xf32>
    %13 = arith.truncf %12 : vector<128x256xf32> to vector<128x256xbf16>
    %c0_7 = arith.constant 0 : index
    %c0_8 = arith.constant 0 : index
    %14 = vector.load %arg5[%c0_7, %c0_8] : memref<256x128xf32, #tpu.memory_space<vmem>>, vector<256x128xf32>
    %15 = arith.truncf %14 : vector<256x128xf32> to vector<256x128xbf16>
    %cst_9 = arith.constant dense<0.000000e+00> : vector<128x128xf32>
    %16 = tpu.matmul %13, %15, %cst_9 {dimension_numbers = #tpu.dot_dimension_numbers<[1], [0], [0], [1], [0, 0, 1, 1], [], []>} : vector<128x256xbf16>, vector<256x128xbf16>, vector<128x128xf32> -> vector<128x128xf32>
    %c0_10 = arith.constant 0 : index
    %c0_11 = arith.constant 0 : index
    %17 = vector.load %arg2[%c0_10, %c0_11] : memref<128x8xf32, #tpu.memory_space<vmem>>, vector<128x8xf32>
    %18 = arith.truncf %17 : vector<128x8xf32> to vector<128x8xbf16>
    %c0_12 = arith.constant 0 : index
    %c0_13 = arith.constant 0 : index
    %19 = vector.load %arg6[%c0_12, %c0_13] : memref<8x128xf32, #tpu.memory_space<vmem>>, vector<8x128xf32>
    %20 = arith.truncf %19 : vector<8x128xf32> to vector<8x128xbf16>
    %cst_14 = arith.constant dense<0.000000e+00> : vector<128x128xf32>
    %21 = tpu.matmul %18, %20, %cst_14 {dimension_numbers = #tpu.dot_dimension_numbers<[1], [0], [0], [1], [0, 0, 1, 1], [], []>} : vector<128x8xbf16>, vector<8x128xbf16>, vector<128x128xf32> -> vector<128x128xf32>
    %22 = arith.addf %16, %21 : vector<128x128xf32>
    %c0_15 = arith.constant 0 : index
    %c0_16 = arith.constant 0 : index
    %23 = vector.load %arg7[%c0_15, %c0_16] : memref<1x128xf32, #tpu.memory_space<vmem>>, vector<1x128xf32>
    %24 = vector.broadcast %23 : vector<1x128xf32> to vector<128x128xf32>
    %25 = arith.addf %22, %24 : vector<128x128xf32>
    %cst_17 = arith.constant 0.000000e+00 : f32
    %26 = vector.broadcast %cst_17 : f32 to vector<128x128xf32>
    %27 = arith.cmpf ogt, %25, %26 : vector<128x128xf32>
    %cst_18 = arith.constant 0.00999999977 : f32
    %28 = vector.broadcast %cst_18 : f32 to vector<128x128xf32>
    %29 = arith.mulf %28, %25 : vector<128x128xf32>
    %30 = arith.select %27, %25, %29 : vector<128x128xi1>, vector<128x128xf32>
    %c0_19 = arith.constant 0 : index
    %c0_20 = arith.constant 0 : index
    %31 = vector.load %arg8[%c0_19, %c0_20] : memref<1x128xf32, #tpu.memory_space<vmem>>, vector<1x128xf32>
    %32 = vector.broadcast %31 : vector<1x128xf32> to vector<128x128xf32>
    %33 = arith.mulf %30, %32 : vector<128x128xf32>
    %cst_21 = arith.constant dense<0.000000e+00> : vector<128xf32>
    %34 = vector.multi_reduction <add>, %33, %cst_21 [1] : vector<128x128xf32> to vector<128xf32>
    %35 = vector.shape_cast %34 : vector<128xf32> to vector<128x1xf32>
    %c0_22 = arith.constant 0 : index
    %c0_23 = arith.constant 0 : index
    %36 = memref.load %arg9[%c0_22, %c0_23] : memref<1x1xf32, #tpu.memory_space<smem>>
    %37 = vector.broadcast %36 : f32 to vector<128x1xf32>
    %38 = arith.addf %35, %37 : vector<128x1xf32>
    %c0_24 = arith.constant 0 : index
    %c0_25 = arith.constant 0 : index
    %39 = vector.load %arg10[%c0_24, %c0_25] : memref<128x1xf32, #tpu.memory_space<vmem>>, vector<128x1xf32>
    tpu.vector_store %arg10[%c0_24, %c0_25], %38 {strides = array<i32>} : memref<128x1xf32, #tpu.memory_space<vmem>>, vector<128x1xf32>,
    return
  }
  func.func @transform_0(%arg0: i32) -> (i32, i32) {
    %c0_i32 = arith.constant 0 : i32
    %c0_i32_0 = arith.constant 0 : i32
    return %arg0, %c0_i32 : i32, i32
  }
  func.func @transform_1(%arg0: i32) -> (i32, i32) {
    %c0_i32 = arith.constant 0 : i32
    %c0_i32_0 = arith.constant 0 : i32
    return %arg0, %c0_i32 : i32, i32
  }
  func.func @transform_2(%arg0: i32) -> (i32, i32) {
    %c0_i32 = arith.constant 0 : i32
    %c0_i32_0 = arith.constant 0 : i32
    %c0_i32_1 = arith.constant 0 : i32
    return %c0_i32, %c0_i32_0 : i32, i32
  }
  func.func @transform_3(%arg0: i32) -> (i32, i32) {
    %c0_i32 = arith.constant 0 : i32
    %c0_i32_0 = arith.constant 0 : i32
    %c0_i32_1 = arith.constant 0 : i32
    return %c0_i32, %c0_i32_0 : i32, i32
  }
  func.func @transform_4(%arg0: i32) -> (i32, i32) {
    %c0_i32 = arith.constant 0 : i32
    %c0_i32_0 = arith.constant 0 : i32
    %c0_i32_1 = arith.constant 0 : i32
    return %c0_i32, %c0_i32_0 : i32, i32
  }
  func.func @transform_5(%arg0: i32) -> (i32, i32) {
    %c0_i32 = arith.constant 0 : i32
    %c0_i32_0 = arith.constant 0 : i32
    %c0_i32_1 = arith.constant 0 : i32
    return %c0_i32, %c0_i32_0 : i32, i32
  }
  func.func @transform_6(%arg0: i32) -> (i32, i32) {
    %c0_i32 = arith.constant 0 : i32
    %c0_i32_0 = arith.constant 0 : i32
    %c0_i32_1 = arith.constant 0 : i32
    return %c0_i32, %c0_i32_0 : i32, i32
  }
  func.func @transform_7(%arg0: i32) -> (i32, i32) {
    %c0_i32 = arith.constant 0 : i32
    %c0_i32_0 = arith.constant 0 : i32
    %c0_i32_1 = arith.constant 0 : i32
    return %c0_i32, %c0_i32_0 : i32, i32
  }
  func.func @transform_8(%arg0: i32) -> (i32, i32) {
    %c0_i32 = arith.constant 0 : i32
    %c0_i32_0 = arith.constant 0 : i32
    %c0_i32_1 = arith.constant 0 : i32
    return %c0_i32, %c0_i32_0 : i32, i32
  }
  func.func @transform_9(%arg0: i32) -> (i32, i32) {
    %c0_i32 = arith.constant 0 : i32
    %c0_i32_0 = arith.constant 0 : i32
    return %arg0, %c0_i32 : i32, i32
  }
}

</mosaic_0001>

<bundles_post_ra>
// kernel: tpu_custom_call.1
= control target key start
LH: loop header
LB: loop body
LE: loop exit
PB: predicated region body
PF: predicated region fallthrough
CT: control target
= control target key end

     0   :  { %s1394_s11 = smov 0   ;;  %s1765_s0 = inlined_call_operand.vmem [shape: f32[256,32], index: 0, kind: input, shape index: {}]   ;;  %s1766_s1 = inlined_call_operand.vmem [shape: f32[256,8], index: 1, kind: input, shape index: {}]   ;;  %s1767_s2 = inlined_call_operand.vmem [shape: f32[32,256], index: 2, kind: input, shape index: {}]   ;;  %s1768_s3 = inlined_call_operand.vmem [shape: f32[1,256], index: 3, kind: input, shape index: {}]   ;;  %s1769_s4 = inlined_call_operand.vmem [shape: f32[256,128], index: 4, kind: input, shape index: {}]   ;;  %s1770_s5 = inlined_call_operand.vmem [shape: f32[8,128], index: 5, kind: input, shape index: {}]   ;;  %s1771_s6 = inlined_call_operand.vmem [shape: f32[1,128], index: 6, kind: input, shape index: {}]   ;;  %s1772_s7 = inlined_call_operand.vmem [shape: f32[1,128], index: 7, kind: input, shape index: {}]   ;;  %s1773_s8 = inlined_call_operand.<no memory space> [shape: f32[1,1], index: 8, kind: input, shape index: {}]   ;;  %s1774_s9 = inlined_call_operand.vmem [shape: f32[256,1], index: 9, kind: output, shape index: {}]  }
   0x1   :  { %14 = sst [smem:[#allocation2]] %s1773_s8 }
   0x2 LB: > { %s1184_s12 = sadd.s32 4294967295, %s1338_s11   ;;  %p1188_p0 = scmp.ge.s32.totalorder %s1338_s11, 1  ;;  %s1338_s11 = sphi %s1394_s11, %s20_s11  }
   0x3   : > { %p300_p1 = scmp.lt.s32.totalorder %s1338_s11, 3 }
   0x5   : > { %p301_p2 = pnand %p1188_p0, %p300_p1 }
   0x6   : > { %v385_v0 = vld [vmem:[%s1767_s2 + $0x8] sm:$0xff] (!%p301_p2)  ;;  %v387_v1 = vld [vmem:[%s1767_s2 + $0x18] sm:$0xff] (!%p301_p2)  ;;  %v384_v2 = vld [vmem:[%s1767_s2] sm:$0xff] (!%p301_p2)  ;;  %s1189_s18 = sshll.u32 (!%p301_p2), %s1184_s12, 4  ;;  %v1340_v7 = vmov (!%p301_p2), 0   ;;  %vm757_vm0 = vcmask (!%p301_p2), 1043456  }
   0x7   : > { %304 = sbr.rel (%p301_p2) target bundleno = 670 (0x29e), region = 56  ;;  %v393_v3 = vpack.c.bf16 (!%p301_p2), %v387_v1, %v385_v0  ;;  %v386_v4 = vld [vmem:[%s1767_s2 + $0x10] sm:$0xff] (!%p301_p2)  ;;  %v389_v5 = vld [vmem:[%s1767_s2 + $0x28] sm:$0xff] (!%p301_p2)  ;;  %v391_v6 = vld [vmem:[%s1767_s2 + $0x38] sm:$0xff] (!%p301_p2)  ;;  %465 = vmatprep.mubr.bf16.mxu0 (!%p301_p2), %v1340_v7  ;;  %p342_p3 = scmp.lt.s32.totalorder (!%p301_p2), %s1189_s18, 31  ;;  %vm408_vm1 = vcmask (!%p301_p2), 261120  }
   0x8   : > { %v392_v8 = vpack.c.bf16 (!%p301_p2), %v386_v4, %v384_v2  ;;  %v395_v9 = vpack.c.bf16 (!%p301_p2), %v391_v6, %v389_v5  ;;  %v388_v10 = vld [vmem:[%s1767_s2 + $0x20] sm:$0xff] (!%p301_p2)  ;;  %v390_v11 = vld [vmem:[%s1767_s2 + $0x30] sm:$0xff] (!%p301_p2)  ;;  %v675_v13 = vld [vmem:[%s1769_s4 + $0x88] sm:$0xff] (!%p301_p2)  ;;  %vm732_vm2 = vcmask (!%p301_p2), 64512   ;;  %s1081_s30 = sld [smem:[#allocation2]] (!%p301_p2) }
   0x9   : > { %v674_v12 = vld [vmem:[%s1769_s4 + $0x80] sm:$0xff] (!%p301_p2)  ;;  %433 = vmatprep.subr.bf16.mxu0 (!%p301_p2), %v393_v3  ;;  %v394_v14 = vpack.c.bf16 (!%p301_p2), %v390_v11, %v388_v10  ;;  %v659_v18 = vld [vmem:[%s1769_s4 + $0x8] sm:$0xff] (!%p301_p2)  ;;  %v676_v20 = vld [vmem:[%s1769_s4 + $0x90] sm:$0xff] (!%p301_p2) }
   0xa   : > { %434 = vmatpush1.bf16.msra.mxu0 (!%p301_p2), %v392_v8  ;;  %v730_v15 = vld [vmem:[%s1770_s5] sm:$0xff] (!%p301_p2)  ;;  %v698_v16 = vpack.c.bf16 (!%p301_p2), %v675_v13, %v674_v12  ;;  %v677_v21 = vld [vmem:[%s1769_s4 + $0x98] sm:$0xff] (!%p301_p2)  ;;  %v660_v28 = vld [vmem:[%s1769_s4 + $0x10] sm:$0xff] (!%p301_p2) }
   0xb   : > { %435 = vmatprep.subr.bf16.mxu0 (!%p301_p2), %v395_v9  ;;  %v658_v17 = vld [vmem:[%s1769_s4] sm:$0xff] (!%p301_p2)  ;;  %v731_v19 = vpack.c.bf16 (!%p301_p2), %v730_v15, %v730_v15  ;;  %v699_v27 = vpack.c.bf16 (!%p301_p2), %v677_v21, %v676_v20  ;;  %v661_v29 = vld [vmem:[%s1769_s4 + $0x18] sm:$0xff] (!%p301_p2)  ;;  %v679_v31 = vld [vmem:[%s1769_s4 + $0xa8] sm:$0xff] (!%p301_p2) }
   0xc   : > { %v690_v26 = vpack.c.bf16 (!%p301_p2), %v659_v18, %v658_v17  ;;  %v678_v30 = vld [vmem:[%s1769_s4 + $0xa0] sm:$0xff] (!%p301_p2)  ;;  %v663_v34 = vld [vmem:[%s1769_s4 + $0x28] sm:$0xff] (!%p301_p2)  ;;  %v691_v38 = vpack.c.bf16 (!%p301_p2), %v661_v29, %v660_v28  ;;  %v680_v46 = vld [vmem:[%s1769_s4 + $0xb0] sm:$0xff] (!%p301_p2) }
   0xd   : > { %1322 = vmatprep.subr.msk.bf16.mxu1 (!%p301_p2), %vm757_vm0, %v731_v19  ;;  %v759_v24 = vsel (!%p301_p2), %vm757_vm0, %v731_v19, 0  ;;  %v662_v33 = vld [vmem:[%s1769_s4 + $0x20] sm:$0xff] (!%p301_p2)  ;;  %v700_v42 = vpack.c.bf16 (!%p301_p2), %v679_v31, %v678_v30  ;;  %v681_v47 = vld [vmem:[%s1769_s4 + $0xb8] sm:$0xff] (!%p301_p2)  ;;  %v664_v54 = vld [vmem:[%s1769_s4 + $0x30] sm:$0xff] (!%p301_p2) }
   0xe   : > { %s1776_s18 = smov (!%p342_p3, %s1189_s18), 31  ;;  %436 = vmatpush1.bf16.msra.mxu0 %v394_v14  ;;  %1289 = vmatpush3.bf16.msra.mxu1 %v759_v24  ;;  %v692_v50 = vpack.c.bf16 %v663_v34, %v662_v33  ;;  %v701_v52 = vpack.c.bf16 %v681_v47, %v680_v46  ;;  %v665_v55 = vld [vmem:[%s1769_s4 + $0x38] sm:$0xff]  ;;  %v682_v56 = vld [vmem:[%s1769_s4 + $0xc0] sm:$0xff]  ;;  %v683_v57 = vld [vmem:[%s1769_s4 + $0xc8] sm:$0xff] }
   0xf   : > { %s1436_s8 = sshll.u32 %s1776_s18, 3  ;;  %1224 = vmatprep.subr.bf16.mxu0 %v698_v16  ;;  %1306 = vmatprep.subr.bf16.mxu1 %v698_v16  ;;  %v693_v61 = vpack.c.bf16 %v665_v55, %v664_v54  ;;  %v702_v62 = vpack.c.bf16 %v683_v57, %v682_v56  ;;  %v666_v63 = vld [vmem:[%s1769_s4 + $0x40] sm:$0xff]  ;;  %v667_v0 = vld [vmem:[%s1769_s4 + $0x48] sm:$0xff]  ;;  %v684_v21 = vld [vmem:[%s1769_s4 + $0xd0] sm:$0xff] }
  0x10   : > { %s1448_s22 = scalar_lea.vmem %s1765_s0, %s1436_s8  ;;  %s1462_s28 = scalar_lea.vmem %s1766_s1, %s1436_s8  ;;  %v694_v2 = vpack.c.bf16 %v667_v0, %v666_v63  ;;  %v669_v28 = vld [vmem:[%s1769_s4 + $0x58] sm:$0xff]  ;;  %v686_v30 = vld [vmem:[%s1769_s4 + $0xe0] sm:$0xff]  ;;  %v687_v31 = vld [vmem:[%s1769_s4 + $0xe8] sm:$0xff] }
  0x11   : > { %v360_v22 = vld [vmem:[%s1448_s22] sm:$0xff]  ;;  %v361_v23 = vld [vmem:[%s1448_s22 + $0x8] sm:$0xff]  ;;  %v362_v32 = vld [vmem:[%s1448_s22 + $0x10] sm:$0xff]  ;;  %s1728_s13 = scalar_lea.vmem %s1774_s9, %s1436_s8 }
  0x12   : > { %v376_v25 = vpack.c.bf16 %v361_v23, %v360_v22  ;;  %v363_v35 = vld [vmem:[%s1448_s22 + $0x18] sm:$0xff]  ;;  %v706_v36 = vld [vmem:[%s1462_s28] sm:$0xff]  ;;  %v707_v37 = vld [vmem:[%s1462_s28 + $0x8] sm:$0xff] }
  0x13   : > { %v722_v39 = vpack.c.bf16 %v707_v37, %v706_v36  ;;  %v708_v40 = vld [vmem:[%s1462_s28 + $0x10] sm:$0xff]  ;;  %v709_v41 = vld [vmem:[%s1462_s28 + $0x18] sm:$0xff]  ;;  %v710_v43 = vld [vmem:[%s1462_s28 + $0x20] sm:$0xff]  ;;  %v377_v48 = vpack.c.bf16 %v363_v35, %v362_v32  ;;  %v704_v32 = vpack.c.bf16 %v687_v31, %v686_v30 }
  0x14   : > { %1195 = vmatmul.mubr.msk.bf16.vlgmr.msra.gmra.mrb[0].mxu0 %vm408_vm1, %v376_v25  ;;  %v723_v44 = vpack.c.bf16 %v709_v41, %v708_v40  ;;  %v711_v45 = vld [vmem:[%s1462_s28 + $0x28] sm:$0xff]  ;;  %v712_v51 = vld [vmem:[%s1462_s28 + $0x30] sm:$0xff]  ;;  %v713_v53 = vld [vmem:[%s1462_s28 + $0x38] sm:$0xff] }
  0x15   : > { %475 = vmatprep.mubr.bf16.mxu0 %v1340_v7  ;;  %1225 = vmatpush3.bf16.msra.mxu0 %v690_v26  ;;  %v724_v49 = vpack.c.bf16 %v711_v45, %v710_v43  ;;  %v364_v58 = vld [vmem:[%s1448_s22 + $0x20] sm:$0xff]  ;;  %v365_v59 = vld [vmem:[%s1448_s22 + $0x28] sm:$0xff]  ;;  %v725_v60 = vpack.c.bf16 %v713_v53, %v712_v51  ;;  %v366_v3 = vld [vmem:[%s1448_s22 + $0x30] sm:$0xff] }
  0x16   : > { %1226 = vmatprep.subr.bf16.mxu0 %v699_v27  ;;  %1290 = vmatprep.mubr.msk.bf16.mxu1 %vm732_vm2, %v722_v39  ;;  %v378_v1 = vpack.c.bf16 %v365_v59, %v364_v58  ;;  %v367_v4 = vld [vmem:[%s1448_s22 + $0x38] sm:$0xff]  ;;  %v368_v6 = vld [vmem:[%s1448_s22 + $0x40] sm:$0xff]  ;;  %v369_v8 = vld [vmem:[%s1448_s22 + $0x48] sm:$0xff] }
  0x17   : > { %1291 = vmatmul.mubr.msk.bf16.vlgmr.msra.gmra.mrb[0].mxu1 %vm732_vm2, %v723_v44  ;;  %v379_v5 = vpack.c.bf16 %v367_v4, %v366_v3  ;;  %v380_v9 = vpack.c.bf16 %v369_v8, %v368_v6  ;;  %v370_v10 = vld [vmem:[%s1448_s22 + $0x50] sm:$0xff]  ;;  %v371_v11 = vld [vmem:[%s1448_s22 + $0x58] sm:$0xff]  ;;  %v372_v13 = vld [vmem:[%s1448_s22 + $0x60] sm:$0xff] }
  0x18   : > { %1314 = vmatpush3.bf16.msra.mxu1 %v690_v26  ;;  %1294 = vmatprep.mubr.msk.bf16.mxu1 %vm732_vm2, %v724_v49  ;;  %v381_v12 = vpack.c.bf16 %v371_v11, %v370_v10  ;;  %v373_v14 = vld [vmem:[%s1448_s22 + $0x68] sm:$0xff]  ;;  %v374_v16 = vld [vmem:[%s1448_s22 + $0x70] sm:$0xff]  ;;  %v375_v17 = vld [vmem:[%s1448_s22 + $0x78] sm:$0xff] }
  0x19   : > { %1227 = vmatpush3.bf16.msra.mxu0 %v691_v38  ;;  %1307 = vmatprep.subr.bf16.mxu1 %v699_v27  ;;  %v382_v15 = vpack.c.bf16 %v373_v14, %v372_v13  ;;  %v383_v18 = vpack.c.bf16 %v375_v17, %v374_v16  ;;  %v714_v19 = vld [vmem:[%s1462_s28 + $0x40] sm:$0xff]  ;;  %v715_v20 = vld [vmem:[%s1462_s28 + $0x48] sm:$0xff]  ;;  %v685_v23 = vld [vmem:[%s1769_s4 + $0xd8] sm:$0xff] }
  0x1a   : > { %1228 = vmatprep.subr.bf16.mxu0 %v700_v42  ;;  %v726_v22 = vpack.c.bf16 %v715_v20, %v714_v19  ;;  %v716_v24 = vld [vmem:[%s1462_s28 + $0x50] sm:$0xff]  ;;  %v717_v25 = vld [vmem:[%s1462_s28 + $0x58] sm:$0xff]  ;;  %v703_v26 = vpack.c.bf16 %v685_v23, %v684_v21  ;;  %v670_v33 = vld [vmem:[%s1769_s4 + $0x60] sm:$0xff] }
  0x1b   : > { %v668_v27 = vld [vmem:[%s1769_s4 + $0x50] sm:$0xff]  ;;  %v671_v34 = vld [vmem:[%s1769_s4 + $0x68] sm:$0xff]  ;;  %v718_v36 = vld [vmem:[%s1462_s28 + $0x60] sm:$0xff] }
  0x1c   : > { %1196 = vmatmul.mubr.msk.bf16.gmra.mrb[4].mxu0 %vm408_vm1, %v377_v48  ;;  %1315 = vmatpush3.bf16.msra.mxu1 %v691_v38  ;;  %v695_v29 = vpack.c.bf16 %v669_v28, %v668_v27  ;;  %v696_v35 = vpack.c.bf16 %v671_v34, %v670_v33  ;;  %v719_v37 = vld [vmem:[%s1462_s28 + $0x68] sm:$0xff]  ;;  %v688_v38 = vld [vmem:[%s1769_s4 + $0xf0] sm:$0xff]  ;;  %v689_v40 = vld [vmem:[%s1769_s4 + $0xf8] sm:$0xff]  ;;  %v398_v48 = vlaneseq }
  0x1d   : > { %485 = vmatprep.mubr.bf16.mxu0 %v1340_v7  ;;  %1229 = vmatpush3.bf16.msra.mxu0 %v692_v50  ;;  %v728_v39 = vpack.c.bf16 %v719_v37, %v718_v36  ;;  %v720_v41 = vld [vmem:[%s1462_s28 + $0x70] sm:$0xff]  ;;  %v705_v43 = vpack.c.bf16 %v689_v40, %v688_v38  ;;  %v673_v46 = vld [vmem:[%s1769_s4 + $0x78] sm:$0xff]  ;;  %v396_v51 = vld [vmem:[%s1768_s3] sm:$0x3] }
  0x1e   : > { %1230 = vmatprep.subr.bf16.mxu0 %v701_v52  ;;  %1308 = vmatprep.subr.bf16.mxu1 %v700_v42  ;;  %v721_v42 = vld [vmem:[%s1462_s28 + $0x78] sm:$0xff]  ;;  %v672_v45 = vld [vmem:[%s1769_s4 + $0x70] sm:$0xff]  ;;  %v399_v49 = vshrl.u32 %v398_v48, 7 }
  0x1f   : > { %1295 = vmatmul.mubr.msk.bf16.gmra.mrb[4].mxu1 %vm732_vm2, %v725_v60  ;;  %v729_v44 = vpack.c.bf16 %v721_v42, %v720_v41  ;;  %v697_v47 = vpack.c.bf16 %v673_v46, %v672_v45 }
  0x20   : > { %1316 = vmatpush3.bf16.msra.mxu1 %v692_v50  ;;  %1298 = vmatprep.mubr.msk.bf16.mxu1 %vm732_vm2, %v726_v22  ;;  %v400_v50 = vsub.s32 0, %v399_v49 }
  0x21   : > { %1231 = vmatpush3.bf16.msra.mxu0 %v693_v61  ;;  %1309 = vmatprep.subr.bf16.mxu1 %v701_v52  ;;  %v404_v52 = vsub.s32 1, %v399_v49 }
  0x22   : > { %1232 = vmatprep.subr.bf16.mxu0 %v702_v62  ;;  %v1598_v53 = vrot.slane %v396_v51, %v400_v50 }
  0x23   : > { %v1600_v54 = vrot.slane %v396_v51, %v404_v52 }
  0x24   : > { %1197 = vmatmul.mubr.msk.bf16.gmra.mrb[8].mxu0 %vm408_vm1, %v378_v1  ;;  %1317 = vmatpush3.bf16.msra.mxu1 %v693_v61 }
  0x25   : > { %495 = vmatprep.mubr.bf16.mxu0 %v1340_v7  ;;  %1233 = vmatpush3.bf16.msra.mxu0 %v694_v2 }
  0x26   : > { %1310 = vmatprep.subr.bf16.mxu1 %v702_v62  ;;  %1234 = vmatprep.subr.bf16.mxu0 %v703_v26 }
  0x28   : > { %1318 = vmatpush3.bf16.msra.mxu1 %v694_v2 }
  0x29   : > { %1235 = vmatpush3.bf16.msra.mxu0 %v695_v29  ;;  %1311 = vmatprep.subr.bf16.mxu1 %v703_v26 }
  0x2a   : > { %1236 = vmatprep.subr.bf16.mxu0 %v704_v32 }
  0x2c   : > { %1198 = vmatmul.mubr.msk.bf16.gmra.mrb[12].mxu0 %vm408_vm1, %v379_v5  ;;  %1319 = vmatpush3.bf16.msra.mxu1 %v695_v29 }
  0x2d   : > { %505 = vmatprep.mubr.bf16.mxu0 %v1340_v7  ;;  %1312 = vmatprep.subr.bf16.mxu1 %v704_v32 }
  0x2e   : > { %1237 = vmatpush3.bf16.msra.mxu0 %v696_v35 }
  0x2f   : > { %1238 = vmatprep.subr.bf16.mxu0 %v705_v43 }
  0x30   : > { %1320 = vmatpush3.bf16.msra.mxu1 %v696_v35 }
  0x31   : > { %1313 = vmatprep.subr.bf16.mxu1 %v705_v43 }
  0x32   : > { %1239 = vmatpush3.bf16.msra.mxu0 %v697_v47 }
  0x34   : > { %1199 = vmatmul.mubr.msk.bf16.gmra.mrb[16].mxu0 %vm408_vm1, %v380_v9  ;;  %1321 = vmatpush3.bf16.msra.mxu1 %v697_v47 }
  0x35   : > { %515 = vmatprep.mubr.bf16.mxu0 %v1340_v7 }
  0x3c   : > { %1200 = vmatmul.mubr.msk.bf16.gmra.mrb[20].mxu0 %vm408_vm1, %v381_v12 }
  0x3d   : > { %525 = vmatprep.mubr.bf16.mxu0 %v1340_v7 }
  0x44   : > { %1201 = vmatmul.mubr.msk.bf16.gmra.mrb[24].mxu0 %vm408_vm1, %v382_v15 }
  0x45   : > { %535 = vmatprep.mubr.bf16.mxu0 %v1340_v7  ;;  %v727_v7 = vpack.c.bf16 %v717_v25, %v716_v24 }
  0x47   : > { %1299 = vmatmul.mubr.msk.bf16.gmra.mrb[8].mxu1 %vm732_vm2, %v727_v7 }
  0x48   : > { %1302 = vmatprep.mubr.msk.bf16.mxu1 %vm732_vm2, %v728_v39 }
  0x4c   : > { %1202 = vmatmul.mubr.msk.bf16.gmra.mrb[28].mxu0 %vm408_vm1, %v383_v18 }
  0x4f   : > { %1303 = vmatmul.mubr.msk.bf16.gmra.mrb[12].mxu1 %vm732_vm2, %v729_v44 }
  0xe7   : > { %v467_v55 = vpop.f32.mrb[0].mxu0 }
  0xe8   : > { %v468_v56 = vadd.f32 %v467_v55, %v1598_v53  ;;  %v469_v57 = vpop.f32.mrb[1].mxu0 }
  0xe9   : > { %v470_v58 = vadd.f32 %v469_v57, %v1600_v54  ;;  %v471_v59 = vpop.f32.mrb[2].mxu0 }
  0xea   : > { %v578_v60 = vmul.f32 0.01, %v468_v56  ;;  %v472_v61 = vadd.f32 %v471_v59, %v1598_v53  ;;  %v473_v62 = vpop.f32.mrb[3].mxu0  ;;  %vm546_vm3 = vcmp.gt.f32.partialorder %v468_v56, 0.0  ;;  %v1606_v2 = vpop.f32.mrb[0].mxu1 }
  0xeb   : > { %v579_v63 = vmul.f32 0.01, %v470_v58  ;;  %v474_v0 = vadd.f32 %v473_v62, %v1600_v54  ;;  %vm547_vm4 = vcmp.gt.f32.partialorder %v470_v58, 0.0  ;;  %v1608_v4 = vpop.f32.mrb[1].mxu1 }
  0xec   : > { %vm548_vm5 = vcmp.gt.f32.partialorder %v472_v61, 0.0  ;;  %v580_v1 = vmul.f32 0.01, %v472_v61  ;;  %v610_v5 = vsel %vm546_vm3, %v468_v56, %v578_v60  ;;  %v1610_v8 = vpop.f32.mrb[2].mxu1 }
  0xed   : > { %vm549_vm6 = vcmp.gt.f32.partialorder %v474_v0, 0.0  ;;  %v581_v3 = vmul.f32 0.01, %v474_v0  ;;  %v611_v11 = vsel %vm547_vm4, %v470_v58, %v579_v63  ;;  %v1612_v13 = vpop.f32.mrb[3].mxu1 }
  0xee   : > { %v612_v6 = vsel %vm548_vm5, %v472_v61, %v580_v1 }
  0xef   : > { %v642_v9 = vpack.c.bf16 %v612_v6, %v610_v5  ;;  %v477_v10 = vpop.f32.mrb[4].mxu0  ;;  %v613_v12 = vsel %vm549_vm6, %v474_v0, %v581_v3 }
  0xf0   : > { %v478_v14 = vadd.f32 %v477_v10, %v1598_v53  ;;  %v479_v15 = vpop.f32.mrb[5].mxu0  ;;  %v643_v16 = vpack.c.bf16 %v613_v12, %v611_v11 }
  0xf1   : > { %v480_v17 = vadd.f32 %v479_v15, %v1600_v54  ;;  %v481_v18 = vpop.f32.mrb[6].mxu0 }
  0xf2   : > { %v582_v19 = vmul.f32 0.01, %v478_v14  ;;  %v482_v20 = vadd.f32 %v481_v18, %v1598_v53  ;;  %v483_v21 = vpop.f32.mrb[7].mxu0  ;;  %890 = vmatprep.mubr.bf16.mxu0 %v643_v16  ;;  %vm550_vm7 = vcmp.gt.f32.partialorder %v478_v14, 0.0  ;;  %v1618_v25 = vpop.f32.mrb[4].mxu1 }
  0xf3   : > { %v583_v22 = vmul.f32 0.01, %v480_v17  ;;  %v484_v23 = vadd.f32 %v483_v21, %v1600_v54  ;;  %891 = vmatmul.mubr.bf16.vlgmr.msra.gmra.mrb[32].mxu0 %v642_v9  ;;  %vm551_vm8 = vcmp.gt.f32.partialorder %v480_v17, 0.0  ;;  %v1620_v7 = vpop.f32.mrb[5].mxu1 }
  0xf4   : > { %vm552_vm9 = vcmp.gt.f32.partialorder %v482_v20, 0.0  ;;  %v584_v24 = vmul.f32 0.01, %v482_v20  ;;  %v614_v27 = vsel %vm550_vm7, %v478_v14, %v582_v19  ;;  %v1622_v29 = vpop.f32.mrb[6].mxu1 }
  0xf5   : > { %vm553_vm10 = vcmp.gt.f32.partialorder %v484_v23, 0.0  ;;  %v585_v26 = vmul.f32 0.01, %v484_v23  ;;  %v615_v32 = vsel %vm551_vm8, %v480_v17, %v583_v22  ;;  %v1624_v34 = vpop.f32.mrb[7].mxu1 }
  0xf6   : > { %v616_v28 = vsel %vm552_vm9, %v482_v20, %v584_v24 }
  0xf7   : > { %v644_v30 = vpack.c.bf16 %v616_v28, %v614_v27  ;;  %v487_v31 = vpop.f32.mrb[8].mxu0  ;;  %v617_v33 = vsel %vm553_vm10, %v484_v23, %v585_v26 }
  0xf8   : > { %v488_v35 = vadd.f32 %v487_v31, %v1598_v53  ;;  %v489_v36 = vpop.f32.mrb[9].mxu0  ;;  %v645_v37 = vpack.c.bf16 %v617_v33, %v615_v32 }
  0xf9   : > { %v490_v38 = vadd.f32 %v489_v36, %v1600_v54  ;;  %v491_v39 = vpop.f32.mrb[10].mxu0 }
  0xfa   : > { %v586_v40 = vmul.f32 0.01, %v488_v35  ;;  %v492_v41 = vadd.f32 %v491_v39, %v1598_v53  ;;  %v493_v42 = vpop.f32.mrb[11].mxu0  ;;  %898 = vmatprep.mubr.bf16.mxu1 %v645_v37  ;;  %vm554_vm11 = vcmp.gt.f32.partialorder %v488_v35, 0.0 }
  0xfb   : > { %v587_v43 = vmul.f32 0.01, %v490_v38  ;;  %v494_v44 = vadd.f32 %v493_v42, %v1600_v54  ;;  %899 = vmatmul.mubr.bf16.vlgmr.msra.gmra.mrb[16].mxu1 %v644_v30  ;;  %vm555_vm12 = vcmp.gt.f32.partialorder %v490_v38, 0.0 }
  0xfc   : > { %vm556_vm13 = vcmp.gt.f32.partialorder %v492_v41, 0.0  ;;  %v588_v45 = vmul.f32 0.01, %v492_v41  ;;  %v618_v47 = vsel %vm554_vm11, %v488_v35, %v586_v40 }
  0xfd   : > { %vm557_vm14 = vcmp.gt.f32.partialorder %v494_v44, 0.0  ;;  %v589_v46 = vmul.f32 0.01, %v494_v44  ;;  %v619_v50 = vsel %vm555_vm12, %v490_v38, %v587_v43 }
  0xfe   : > { %v620_v48 = vsel %vm556_vm13, %v492_v41, %v588_v45 }
  0xff   : > { %v497_v49 = vpop.f32.mrb[12].mxu0  ;;  %v621_v51 = vsel %vm557_vm14, %v494_v44, %v589_v46  ;;  %v646_v52 = vpack.c.bf16 %v620_v48, %v618_v47 }
 0x100   : > { %v498_v55 = vadd.f32 %v497_v49, %v1598_v53  ;;  %v499_v56 = vpop.f32.mrb[13].mxu0  ;;  %v647_v57 = vpack.c.bf16 %v621_v51, %v619_v50 }
 0x101   : > { %v500_v58 = vadd.f32 %v499_v56, %v1600_v54  ;;  %v501_v59 = vpop.f32.mrb[14].mxu0 }
 0x102   : > { %v590_v60 = vmul.f32 0.01, %v498_v55  ;;  %v502_v61 = vadd.f32 %v501_v59, %v1598_v53  ;;  %v503_v62 = vpop.f32.mrb[15].mxu0  ;;  %906 = vmatprep.mubr.bf16.mxu1 %v647_v57  ;;  %vm558_vm15 = vcmp.gt.f32.partialorder %v498_v55, 0.0 }
 0x103   : > { %v591_v63 = vmul.f32 0.01, %v500_v58  ;;  %v504_v0 = vadd.f32 %v503_v62, %v1600_v54  ;;  %907 = vmatmul.mubr.bf16.gmra.mrb[20].mxu1 %v646_v52  ;;  %vm559_vm0 = vcmp.gt.f32.partialorder %v500_v58, 0.0 }
 0x104   : > { %vm560_vm1 = vcmp.gt.f32.partialorder %v502_v61, 0.0  ;;  %v592_v1 = vmul.f32 0.01, %v502_v61  ;;  %v622_v5 = vsel %vm558_vm15, %v498_v55, %v590_v60 }
 0x105   : > { %vm561_vm2 = vcmp.gt.f32.partialorder %v504_v0, 0.0  ;;  %v593_v3 = vmul.f32 0.01, %v504_v0  ;;  %v623_v10 = vsel %vm559_vm0, %v500_v58, %v591_v63 }
 0x106   : > { %v624_v6 = vsel %vm560_vm1, %v502_v61, %v592_v1 }
 0x107   : > { %v507_v9 = vpop.f32.mrb[16].mxu0  ;;  %v625_v11 = vsel %vm561_vm2, %v504_v0, %v593_v3  ;;  %v648_v12 = vpack.c.bf16 %v624_v6, %v622_v5 }
 0x108   : > { %v508_v14 = vadd.f32 %v507_v9, %v1598_v53  ;;  %v509_v15 = vpop.f32.mrb[17].mxu0  ;;  %v649_v16 = vpack.c.bf16 %v625_v11, %v623_v10 }
 0x109   : > { %v510_v17 = vadd.f32 %v509_v15, %v1600_v54  ;;  %v511_v18 = vpop.f32.mrb[18].mxu0 }
 0x10a   : > { %v594_v19 = vmul.f32 0.01, %v508_v14  ;;  %v512_v20 = vadd.f32 %v511_v18, %v1598_v53  ;;  %v513_v21 = vpop.f32.mrb[19].mxu0  ;;  %914 = vmatprep.mubr.bf16.mxu1 %v649_v16  ;;  %vm562_vm3 = vcmp.gt.f32.partialorder %v508_v14, 0.0 }
 0x10b   : > { %v595_v22 = vmul.f32 0.01, %v510_v17  ;;  %v514_v23 = vadd.f32 %v513_v21, %v1600_v54  ;;  %915 = vmatmul.mubr.bf16.gmra.mrb[24].mxu1 %v648_v12  ;;  %vm563_vm4 = vcmp.gt.f32.partialorder %v510_v17, 0.0 }
 0x10c   : > { %vm564_vm5 = vcmp.gt.f32.partialorder %v512_v20, 0.0  ;;  %v596_v24 = vmul.f32 0.01, %v512_v20  ;;  %v626_v27 = vsel %vm562_vm3, %v508_v14, %v594_v19 }
 0x10d   : > { %vm565_vm6 = vcmp.gt.f32.partialorder %v514_v23, 0.0  ;;  %v597_v26 = vmul.f32 0.01, %v514_v23  ;;  %v627_v31 = vsel %vm563_vm4, %v510_v17, %v595_v22 }
 0x10e   : > { %v628_v28 = vsel %vm564_vm5, %v512_v20, %v596_v24 }
 0x10f   : > { %v517_v30 = vpop.f32.mrb[20].mxu0  ;;  %v629_v32 = vsel %vm565_vm6, %v514_v23, %v597_v26  ;;  %v650_v33 = vpack.c.bf16 %v628_v28, %v626_v27 }
 0x110   : > { %v518_v35 = vadd.f32 %v517_v30, %v1598_v53  ;;  %v519_v36 = vpop.f32.mrb[21].mxu0  ;;  %v651_v37 = vpack.c.bf16 %v629_v32, %v627_v31 }
 0x111   : > { %v520_v38 = vadd.f32 %v519_v36, %v1600_v54  ;;  %v521_v39 = vpop.f32.mrb[22].mxu0 }
 0x112   : > { %v598_v40 = vmul.f32 0.01, %v518_v35  ;;  %v522_v41 = vadd.f32 %v521_v39, %v1598_v53  ;;  %v523_v42 = vpop.f32.mrb[23].mxu0  ;;  %922 = vmatprep.mubr.bf16.mxu1 %v651_v37  ;;  %vm566_vm7 = vcmp.gt.f32.partialorder %v518_v35, 0.0 }
 0x113   : > { %v599_v43 = vmul.f32 0.01, %v520_v38  ;;  %v524_v44 = vadd.f32 %v523_v42, %v1600_v54  ;;  %923 = vmatmul.mubr.bf16.gmra.mrb[28].mxu1 %v650_v33  ;;  %vm567_vm8 = vcmp.gt.f32.partialorder %v520_v38, 0.0 }
 0x114   : > { %vm568_vm9 = vcmp.gt.f32.partialorder %v522_v41, 0.0  ;;  %v600_v45 = vmul.f32 0.01, %v522_v41  ;;  %v630_v47 = vsel %vm566_vm7, %v518_v35, %v598_v40 }
 0x115   : > { %vm569_vm10 = vcmp.gt.f32.partialorder %v524_v44, 0.0  ;;  %v601_v46 = vmul.f32 0.01, %v524_v44  ;;  %v631_v50 = vsel %vm567_vm8, %v520_v38, %v599_v43 }
 0x116   : > { %v632_v48 = vsel %vm568_vm9, %v522_v41, %v600_v45  ;;  %v1669_v45 = vld [vmem:[%s1771_s6] ss:$0 sm:$0xff] }
 0x117   : > { %v527_v49 = vpop.f32.mrb[24].mxu0  ;;  %v633_v51 = vsel %vm569_vm10, %v524_v44, %v601_v46  ;;  %v652_v52 = vpack.c.bf16 %v632_v48, %v630_v47 }
 0x118   : > { %v528_v55 = vadd.f32 %v527_v49, %v1598_v53  ;;  %v529_v56 = vpop.f32.mrb[25].mxu0  ;;  %v653_v57 = vpack.c.bf16 %v633_v51, %v631_v50 }
 0x119   : > { %v530_v58 = vadd.f32 %v529_v56, %v1600_v54  ;;  %v531_v59 = vpop.f32.mrb[26].mxu0  ;;  %v1678_v56 = vld [vmem:[%s1772_s7] ss:$0 sm:$0xff] }
 0x11a   : > { %v602_v60 = vmul.f32 0.01, %v528_v55  ;;  %v532_v61 = vadd.f32 %v531_v59, %v1598_v53  ;;  %v533_v62 = vpop.f32.mrb[27].mxu0  ;;  %930 = vmatprep.mubr.bf16.mxu1 %v653_v57  ;;  %vm570_vm11 = vcmp.gt.f32.partialorder %v528_v55, 0.0 }
 0x11b   : > { %v603_v63 = vmul.f32 0.01, %v530_v58  ;;  %v534_v0 = vadd.f32 %v533_v62, %v1600_v54  ;;  %931 = vmatmul.mubr.bf16.gmra.mrb[32].mxu1 %v652_v52  ;;  %vm571_vm12 = vcmp.gt.f32.partialorder %v530_v58, 0.0 }
 0x11c   : > { %vm572_vm13 = vcmp.gt.f32.partialorder %v532_v61, 0.0  ;;  %v604_v1 = vmul.f32 0.01, %v532_v61  ;;  %v634_v5 = vsel %vm570_vm11, %v528_v55, %v602_v60 }
 0x11d   : > { %vm573_vm14 = vcmp.gt.f32.partialorder %v534_v0, 0.0  ;;  %v605_v3 = vmul.f32 0.01, %v534_v0  ;;  %v635_v10 = vsel %vm571_vm12, %v530_v58, %v603_v63 }
 0x11e   : > { %v636_v6 = vsel %vm572_vm13, %v532_v61, %v604_v1 }
 0x11f   : > { %v537_v9 = vpop.f32.mrb[28].mxu0  ;;  %v637_v11 = vsel %vm573_vm14, %v534_v0, %v605_v3  ;;  %v654_v12 = vpack.c.bf16 %v636_v6, %v634_v5 }
 0x120   : > { %v538_v14 = vadd.f32 %v537_v9, %v1598_v53  ;;  %v539_v15 = vpop.f32.mrb[29].mxu0  ;;  %v655_v16 = vpack.c.bf16 %v637_v11, %v635_v10 }
 0x121   : > { %v540_v17 = vadd.f32 %v539_v15, %v1600_v54  ;;  %v541_v18 = vpop.f32.mrb[30].mxu0 }
 0x122   : > { %v606_v19 = vmul.f32 0.01, %v538_v14  ;;  %v542_v20 = vadd.f32 %v541_v18, %v1598_v53  ;;  %v543_v21 = vpop.f32.mrb[31].mxu0  ;;  %938 = vmatprep.mubr.bf16.mxu1 %v655_v16  ;;  %vm574_vm15 = vcmp.gt.f32.partialorder %v538_v14, 0.0  ;;  %v1650_v53 = vpop.f32.mrb[8].mxu1 }
 0x123   : > { %v607_v22 = vmul.f32 0.01, %v540_v17  ;;  %v544_v23 = vadd.f32 %v543_v21, %v1600_v54  ;;  %939 = vmatmul.mubr.bf16.gmra.mrb[36].mxu1 %v654_v12  ;;  %vm575_vm0 = vcmp.gt.f32.partialorder %v540_v17, 0.0  ;;  %v1652_v35 = vpop.f32.mrb[9].mxu1 }
 0x124   : > { %vm576_vm1 = vcmp.gt.f32.partialorder %v542_v20, 0.0  ;;  %v608_v24 = vmul.f32 0.01, %v542_v20  ;;  %v638_v27 = vsel %vm574_vm15, %v538_v14, %v606_v19  ;;  %v1654_v36 = vpop.f32.mrb[10].mxu1 }
 0x125   : > { %vm577_vm2 = vcmp.gt.f32.partialorder %v544_v23, 0.0  ;;  %v609_v26 = vmul.f32 0.01, %v544_v23  ;;  %v639_v30 = vsel %vm575_vm0, %v540_v17, %v607_v22  ;;  %v1656_v54 = vpop.f32.mrb[11].mxu1 }
 0x126   : > { %v640_v28 = vsel %vm576_vm1, %v542_v20, %v608_v24  ;;  %v1658_v37 = vpop.f32.mrb[12].mxu1 }
 0x127   : > { %v641_v31 = vsel %vm577_vm2, %v544_v23, %v609_v26  ;;  %v656_v32 = vpack.c.bf16 %v640_v28, %v638_v27  ;;  %v1660_v38 = vpop.f32.mrb[13].mxu1 }
 0x128   : > { %v657_v33 = vpack.c.bf16 %v641_v31, %v639_v30  ;;  %v1662_v39 = vpop.f32.mrb[14].mxu1 }
 0x129   : > { %v1664_v40 = vpop.f32.mrb[15].mxu1 }
 0x12a   : > { %946 = vmatprep.mubr.bf16.mxu1 %v657_v33 }
 0x12b   : > { %947 = vmatmul.mubr.bf16.gmra.mrb[40].mxu1 %v656_v32 }
 0x1c6   : > { %v1240_v41 = vpop.f32.mrb[32].mxu0 }
 0x1c7   : > { %v1241_v42 = vpop.f32.mrb[33].mxu0 }
 0x1c8   : > { %v1242_v43 = vadd.f32 %v1241_v42, %v1240_v41  ;;  %v1243_v44 = vpop.f32.mrb[34].mxu0 }
 0x1c9   : > { %v1244_v46 = vpop.f32.mrb[35].mxu0 }
 0x1ca   : > { %v893_v47 = vadd.f32 %v1242_v43, %v1608_v4  ;;  %v1245_v48 = vadd.f32 %v1244_v46, %v1243_v44 }
 0x1cc   : > { %v962_v49 = vadd.f32 %v1669_v45, %v893_v47  ;;  %v896_v50 = vadd.f32 %v1245_v48, %v1612_v13 }
 0x1ce   : > { %v963_v51 = vadd.f32 %v1669_v45, %v896_v50  ;;  %v1246_v52 = vpop.f32.mrb[16].mxu1  ;;  %vm978_vm3 = vcmp.gt.f32.partialorder %v962_v49, 0.0  ;;  %v994_v55 = vmul.f32 0.01, %v962_v49 }
 0x1cf   : > { %v1247_v57 = vpop.f32.mrb[17].mxu1 }
 0x1d0   : > { %v1248_v58 = vadd.f32 %v1247_v57, %v1246_v52  ;;  %v1249_v59 = vpop.f32.mrb[18].mxu1  ;;  %v1010_v60 = vsel %vm978_vm3, %v962_v49, %v994_v55  ;;  %vm979_vm4 = vcmp.gt.f32.partialorder %v963_v51, 0.0  ;;  %v995_v4 = vmul.f32 0.01, %v963_v51 }
 0x1d1   : > { %v1250_v61 = vpop.f32.mrb[19].mxu1  ;;  %v1033_v62 = vmul.f32 %v1678_v56, %v1010_v60  ;;  %vm1099_vm3 = vcmask 7168  }
 0x1d2   : > { %v901_v13 = vadd.f32 %v1606_v2, %v1248_v58  ;;  %v1251_v63 = vadd.f32 %v1250_v61, %v1249_v59  ;;  %v1011_v0 = vsel %vm979_vm4, %v963_v51, %v995_v4 }
 0x1d3   : > { %1049 = vadd.xlane.f32.xlu0 %v1033_v62  ;;  %v1034_v5 = vmul.f32 %v1678_v56, %v1011_v0 }
 0x1d4   : > { %v964_v1 = vadd.f32 %v1669_v45, %v901_v13  ;;  %v904_v3 = vadd.f32 %v1610_v8, %v1251_v63 }
 0x1d6   : > { %v965_v6 = vadd.f32 %v1669_v45, %v904_v3  ;;  %v1252_v9 = vpop.f32.mrb[20].mxu1  ;;  %vm980_vm5 = vcmp.gt.f32.partialorder %v964_v1, 0.0  ;;  %v996_v10 = vmul.f32 0.01, %v964_v1 }
 0x1d7   : > { %v1253_v11 = vpop.f32.mrb[21].mxu1  ;;  %1051 = vadd.xlane.f32.xlu0 %v1034_v5 }
 0x1d8   : > { %v1254_v12 = vadd.f32 %v1253_v11, %v1252_v9  ;;  %v1255_v14 = vpop.f32.mrb[22].mxu1  ;;  %v1012_v15 = vsel %vm980_vm5, %v964_v1, %v996_v10  ;;  %vm981_vm6 = vcmp.gt.f32.partialorder %v965_v6, 0.0  ;;  %v997_v2 = vmul.f32 0.01, %v965_v6 }
 0x1d9   : > { %v1256_v16 = vpop.f32.mrb[23].mxu1  ;;  %v1035_v17 = vmul.f32 %v1678_v56, %v1012_v15 }
 0x1da   : > { %v909_v18 = vadd.f32 %v1254_v12, %v1620_v7  ;;  %v1257_v8 = vadd.f32 %v1256_v16, %v1255_v14  ;;  %v1013_v19 = vsel %vm981_vm6, %v965_v6, %v997_v2 }
 0x1db   : > { %1053 = vadd.xlane.f32.xlu1 %v1035_v17  ;;  %v1036_v22 = vmul.f32 %v1678_v56, %v1013_v19 }
 0x1dc   : > { %v966_v20 = vadd.f32 %v1669_v45, %v909_v18  ;;  %v912_v21 = vadd.f32 %v1257_v8, %v1624_v34 }
 0x1de   : > { %v967_v23 = vadd.f32 %v1669_v45, %v912_v21  ;;  %v1258_v24 = vpop.f32.mrb[24].mxu1  ;;  %vm982_vm7 = vcmp.gt.f32.partialorder %v966_v20, 0.0  ;;  %v998_v26 = vmul.f32 0.01, %v966_v20 }
 0x1df   : > { %v1259_v27 = vpop.f32.mrb[25].mxu1  ;;  %1055 = vadd.xlane.f32.xlu1 %v1036_v22 }
 0x1e0   : > { %v1260_v28 = vadd.f32 %v1259_v27, %v1258_v24  ;;  %v1261_v30 = vpop.f32.mrb[26].mxu1  ;;  %v1014_v31 = vsel %vm982_vm7, %v966_v20, %v998_v26  ;;  %vm983_vm8 = vcmp.gt.f32.partialorder %v967_v23, 0.0  ;;  %v999_v7 = vmul.f32 0.01, %v967_v23 }
 0x1e1   : > { %v1262_v32 = vpop.f32.mrb[27].mxu1  ;;  %v1037_v33 = vmul.f32 %v1678_v56, %v1014_v31 }
 0x1e2   : > { %v917_v41 = vadd.f32 %v1618_v25, %v1260_v28  ;;  %v1263_v34 = vadd.f32 %v1262_v32, %v1261_v30  ;;  %v1015_v42 = vsel %vm983_vm8, %v967_v23, %v999_v7 }
 0x1e3   : > { %1057 = vadd.xlane.f32.xlu0 %v1037_v33  ;;  %v1038_v43 = vmul.f32 %v1678_v56, %v1015_v42 }
 0x1e4   : > { %v968_v44 = vadd.f32 %v1669_v45, %v917_v41  ;;  %v920_v46 = vadd.f32 %v1622_v29, %v1263_v34 }
 0x1e5   : > { %1059 = vadd.xlane.f32.xlu1 %v1038_v43 }
 0x1e6   : > { %v969_v47 = vadd.f32 %v1669_v45, %v920_v46  ;;  %v1264_v48 = vpop.f32.mrb[28].mxu1  ;;  %vm984_vm9 = vcmp.gt.f32.partialorder %v968_v44, 0.0  ;;  %v1000_v49 = vmul.f32 0.01, %v968_v44 }
 0x1e7   : > { %v1265_v50 = vpop.f32.mrb[29].mxu1 }
 0x1e8   : > { %v1266_v51 = vadd.f32 %v1265_v50, %v1264_v48  ;;  %v1267_v52 = vpop.f32.mrb[30].mxu1  ;;  %v1016_v55 = vsel %vm984_vm9, %v968_v44, %v1000_v49  ;;  %vm985_vm10 = vcmp.gt.f32.partialorder %v969_v47, 0.0  ;;  %v1001_v25 = vmul.f32 0.01, %v969_v47 }
 0x1e9   : > { %v1268_v57 = vpop.f32.mrb[31].mxu1  ;;  %v1039_v58 = vmul.f32 %v1678_v56, %v1016_v55 }
 0x1ea   : > { %v925_v59 = vadd.f32 %v1266_v51, %v1652_v35  ;;  %v1269_v60 = vadd.f32 %v1268_v57, %v1267_v52  ;;  %v1017_v4 = vsel %vm985_vm10, %v969_v47, %v1001_v25 }
 0x1eb   : > { %1061 = vadd.xlane.f32.xlu0 %v1039_v58  ;;  %v1040_v29 = vmul.f32 %v1678_v56, %v1017_v4 }
 0x1ec   : > { %v970_v61 = vadd.f32 %v1669_v45, %v925_v59  ;;  %v928_v62 = vadd.f32 %v1269_v60, %v1656_v54  ;;  %v1082_v59 = vstv %s1081_s30 }
 0x1ed   : > { %1063 = vadd.xlane.f32.xlu1 %v1040_v29 }
 0x1ee   : > { %v971_v13 = vadd.f32 %v1669_v45, %v928_v62  ;;  %v1270_v63 = vpop.f32.mrb[32].mxu1  ;;  %vm986_vm11 = vcmp.gt.f32.partialorder %v970_v61, 0.0  ;;  %v1002_v0 = vmul.f32 0.01, %v970_v61 }
 0x1ef   : > { %v1271_v1 = vpop.f32.mrb[33].mxu1 }
 0x1f0   : > { %v1272_v3 = vadd.f32 %v1271_v1, %v1270_v63  ;;  %v1273_v5 = vpop.f32.mrb[34].mxu1  ;;  %v1018_v6 = vsel %vm986_vm11, %v970_v61, %v1002_v0  ;;  %vm987_vm12 = vcmp.gt.f32.partialorder %v971_v13, 0.0  ;;  %v1003_v35 = vmul.f32 0.01, %v971_v13 }
 0x1f1   : > { %v1274_v9 = vpop.f32.mrb[35].mxu1  ;;  %v1041_v10 = vmul.f32 %v1678_v56, %v1018_v6 }
 0x1f2   : > { %v933_v11 = vadd.f32 %v1650_v53, %v1272_v3  ;;  %v1275_v12 = vadd.f32 %v1274_v9, %v1273_v5  ;;  %v1019_v14 = vsel %vm987_vm12, %v971_v13, %v1003_v35 }
 0x1f3   : > { %1065 = vadd.xlane.f32.xlu0 %v1041_v10  ;;  %v1042_v54 = vmul.f32 %v1678_v56, %v1019_v14 }
 0x1f4   : > { %v972_v15 = vadd.f32 %v1669_v45, %v933_v11  ;;  %v936_v2 = vadd.f32 %v1654_v36, %v1275_v12 }
 0x1f5   : > { %1067 = vadd.xlane.f32.xlu1 %v1042_v54 }
 0x1f6   : > { %v973_v16 = vadd.f32 %v1669_v45, %v936_v2  ;;  %v1276_v17 = vpop.f32.mrb[36].mxu1  ;;  %vm988_vm13 = vcmp.gt.f32.partialorder %v972_v15, 0.0  ;;  %v1004_v18 = vmul.f32 0.01, %v972_v15 }
 0x1f7   : > { %v1277_v8 = vpop.f32.mrb[37].mxu1 }
 0x1f8   : > { %v1278_v19 = vadd.f32 %v1277_v8, %v1276_v17  ;;  %v1279_v20 = vpop.f32.mrb[38].mxu1  ;;  %v1020_v21 = vsel %vm988_vm13, %v972_v15, %v1004_v18  ;;  %vm989_vm14 = vcmp.gt.f32.partialorder %v973_v16, 0.0  ;;  %v1005_v53 = vmul.f32 0.01, %v973_v16 }
 0x1f9   : > { %v1280_v22 = vpop.f32.mrb[39].mxu1  ;;  %v1043_v23 = vmul.f32 %v1678_v56, %v1020_v21 }
 0x1fa   : > { %v941_v24 = vadd.f32 %v1278_v19, %v1660_v38  ;;  %v1281_v26 = vadd.f32 %v1280_v22, %v1279_v20  ;;  %v1021_v27 = vsel %vm989_vm14, %v973_v16, %v1005_v53 }
 0x1fb   : > { %1069 = vadd.xlane.f32.xlu0 %v1043_v23  ;;  %v1044_v36 = vmul.f32 %v1678_v56, %v1021_v27 }
 0x1fc   : > { %v974_v28 = vadd.f32 %v1669_v45, %v941_v24  ;;  %v944_v30 = vadd.f32 %v1281_v26, %v1664_v40 }
 0x1fd   : > { %1071 = vadd.xlane.f32.xlu1 %v1044_v36 }
 0x1fe   : > { %v975_v31 = vadd.f32 %v1669_v45, %v944_v30  ;;  %v1282_v7 = vpop.f32.mrb[40].mxu1  ;;  %vm990_vm15 = vcmp.gt.f32.partialorder %v974_v28, 0.0  ;;  %v1006_v32 = vmul.f32 0.01, %v974_v28 }
 0x1ff   : > { %v1283_v33 = vpop.f32.mrb[41].mxu1 }
 0x200   : > { %v1284_v41 = vadd.f32 %v1283_v33, %v1282_v7  ;;  %v1285_v34 = vpop.f32.mrb[42].mxu1  ;;  %v1022_v42 = vsel %vm990_vm15, %v974_v28, %v1006_v32  ;;  %vm991_vm0 = vcmp.gt.f32.partialorder %v975_v31, 0.0  ;;  %v1007_v38 = vmul.f32 0.01, %v975_v31 }
 0x201   : > { %v1286_v43 = vpop.f32.mrb[43].mxu1  ;;  %v1045_v44 = vmul.f32 %v1678_v56, %v1022_v42 }
 0x202   : > { %v949_v46 = vadd.f32 %v1658_v37, %v1284_v41  ;;  %v1287_v47 = vadd.f32 %v1286_v43, %v1285_v34  ;;  %v1023_v48 = vsel %vm991_vm0, %v975_v31, %v1007_v38 }
 0x203   : > { %1073 = vadd.xlane.f32.xlu0 %v1045_v44  ;;  %v1046_v40 = vmul.f32 %v1678_v56, %v1023_v48 }
 0x204   : > { %v976_v49 = vadd.f32 %v1669_v45, %v949_v46  ;;  %v952_v50 = vadd.f32 %v1662_v39, %v1287_v47 }
 0x205   : > { %1075 = vadd.xlane.f32.xlu1 %v1046_v40 }
 0x206   : > { %v977_v51 = vadd.f32 %v1669_v45, %v952_v50  ;;  %vm992_vm1 = vcmp.gt.f32.partialorder %v976_v49, 0.0  ;;  %v1008_v52 = vmul.f32 0.01, %v976_v49 }
 0x208   : > { %v1024_v55 = vsel %vm992_vm1, %v976_v49, %v1008_v52  ;;  %vm993_vm2 = vcmp.gt.f32.partialorder %v977_v51, 0.0  ;;  %v1009_v25 = vmul.f32 0.01, %v977_v51 }
 0x209   : > { %v1047_v37 = vmul.f32 %v1678_v56, %v1024_v55 }
 0x20a   : > { %v1025_v57 = vsel %vm993_vm2, %v977_v51, %v1009_v25 }
 0x20b   : > { %1077 = vadd.xlane.f32.xlu0 %v1047_v37  ;;  %v1048_v58 = vmul.f32 %v1678_v56, %v1025_v57 }
 0x20d   : > { %1079 = vadd.xlane.f32.xlu1 %v1048_v58 }
 0x260   : > { %v1050_v39 = vpop.xlane.xlu0 %1049 }
 0x261   : > { %v1083_v45 = vadd.f32 %v1082_v59, %v1050_v39 }
 0x263   : > { %1100 = vst.msk [vmem:[%s1728_s13] sm:$0xff] %vm1099_vm3, %v1083_v45 }
 0x264   : > { %v1052_v56 = vpop.xlane.xlu0 %1051 }
 0x265   : > { %v1084_v60 = vadd.f32 %v1082_v59, %v1052_v56 }
 0x267   : > { %1101 = vst.msk [vmem:[%s1728_s13 + $0x8] sm:$0xff] %vm1099_vm3, %v1084_v60 }
 0x268   : > { %v1054_v4 = vpop.xlane.xlu1 %1053 }
 0x269   : > { %v1085_v29 = vadd.f32 %v1082_v59, %v1054_v4 }
 0x26b   : > { %1102 = vst.msk [vmem:[%s1728_s13 + $0x10] sm:$0xff] %vm1099_vm3, %v1085_v29 }
 0x26c   : > { %v1056_v61 = vpop.xlane.xlu1 %1055 }
 0x26d   : > { %v1086_v62 = vadd.f32 %v1082_v59, %v1056_v61 }
 0x26f   : > { %1103 = vst.msk [vmem:[%s1728_s13 + $0x18] sm:$0xff] %vm1099_vm3, %v1086_v62 }
 0x270   : > { %v1058_v13 = vpop.xlane.xlu0 %1057 }
 0x271   : > { %v1087_v63 = vadd.f32 %v1082_v59, %v1058_v13 }
 0x272   : > { %v1060_v0 = vpop.xlane.xlu1 %1059 }
 0x273   : > { %1104 = vst.msk [vmem:[%s1728_s13 + $0x20] sm:$0xff] %vm1099_vm3, %v1087_v63  ;;  %v1088_v1 = vadd.f32 %v1082_v59, %v1060_v0 }
 0x275   : > { %1105 = vst.msk [vmem:[%s1728_s13 + $0x28] sm:$0xff] %vm1099_vm3, %v1088_v1 }
 0x278   : > { %v1062_v3 = vpop.xlane.xlu0 %1061 }
 0x279   : > { %v1089_v5 = vadd.f32 %v1082_v59, %v1062_v3 }
 0x27a   : > { %v1064_v6 = vpop.xlane.xlu1 %1063 }
 0x27b   : > { %1106 = vst.msk [vmem:[%s1728_s13 + $0x30] sm:$0xff] %vm1099_vm3, %v1089_v5  ;;  %v1090_v35 = vadd.f32 %v1082_v59, %v1064_v6 }
 0x27d   : > { %1107 = vst.msk [vmem:[%s1728_s13 + $0x38] sm:$0xff] %vm1099_vm3, %v1090_v35 }
 0x280   : > { %v1066_v9 = vpop.xlane.xlu0 %1065 }
 0x281   : > { %v1091_v10 = vadd.f32 %v1082_v59, %v1066_v9 }
 0x282   : > { %v1068_v11 = vpop.xlane.xlu1 %1067 }
 0x283   : > { %1108 = vst.msk [vmem:[%s1728_s13 + $0x40] sm:$0xff] %vm1099_vm3, %v1091_v10  ;;  %v1092_v12 = vadd.f32 %v1082_v59, %v1068_v11 }
 0x285   : > { %1109 = vst.msk [vmem:[%s1728_s13 + $0x48] sm:$0xff] %vm1099_vm3, %v1092_v12 }
 0x288   : > { %v1070_v14 = vpop.xlane.xlu0 %1069 }
 0x289   : > { %v1093_v54 = vadd.f32 %v1082_v59, %v1070_v14 }
 0x28a   : > { %v1072_v15 = vpop.xlane.xlu1 %1071 }
 0x28b   : > { %1110 = vst.msk [vmem:[%s1728_s13 + $0x50] sm:$0xff] %vm1099_vm3, %v1093_v54  ;;  %v1094_v2 = vadd.f32 %v1082_v59, %v1072_v15 }
 0x28d   : > { %1111 = vst.msk [vmem:[%s1728_s13 + $0x58] sm:$0xff] %vm1099_vm3, %v1094_v2 }
 0x290   : > { %v1074_v16 = vpop.xlane.xlu0 %1073 }
 0x291   : > { %v1095_v17 = vadd.f32 %v1082_v59, %v1074_v16 }
 0x292   : > { %v1076_v18 = vpop.xlane.xlu1 %1075 }
 0x293   : > { %1112 = vst.msk [vmem:[%s1728_s13 + $0x60] sm:$0xff] %vm1099_vm3, %v1095_v17  ;;  %v1096_v8 = vadd.f32 %v1082_v59, %v1076_v18 }
 0x295   : > { %1113 = vst.msk [vmem:[%s1728_s13 + $0x68] sm:$0xff] %vm1099_vm3, %v1096_v8 }
 0x298   : > { %v1078_v19 = vpop.xlane.xlu0 %1077 }
 0x299   : > { %v1097_v20 = vadd.f32 %v1082_v59, %v1078_v19 }
 0x29a   : > { %v1080_v21 = vpop.xlane.xlu1 %1079 }
 0x29b   : > { %1114 = vst.msk [vmem:[%s1728_s13 + $0x70] sm:$0xff] %vm1099_vm3, %v1097_v20  ;;  %v1098_v53 = vadd.f32 %v1082_v59, %v1080_v21 }
 0x29d   : > { %1115 = vst.msk [vmem:[%s1728_s13 + $0x78] sm:$0xff] %vm1099_vm3, %v1098_v53 }
 0x29e PF: > { %s20_s11 = sadd.s32 1, %s1338_s11  }
 0x29f   : > { %p17_p4 = scmp.ge.s32.totalorder %s20_s11, 4  }
 0x2a1   :  { %19 = sbr.rel (!%p17_p4) target bundleno = 2 (0x2), region = 89 }

</bundles_post_ra>
